<compile_context>
chip_gen: v5e
topology: v5e:2x2
jax: 0.10.0
libtpu: 0.0.40
codegen_flags: <defaults>
</compile_context>

<pallas_src>
import jax
import jax.numpy as jnp
from jax.experimental import pallas as pl
from jax.experimental.pallas import tpu as pltpu

_NEG_FILL = -1e30  # finite "minus infinity" for class padding (keeps 0*pad finite)


def _round_up(x, m):
    return (x + m - 1) // m * m


def _integer_mix_loss_kernel(gamma_ref, x_ref, t_ref, pt_ref, out_ref,
                             m_sc, l_sc, p_sc):
    """One (tn, tc) logits tile: online log-sum-exp over the class axis plus a
    single gamma-weighted label gather, fused into one pass over the tile."""
    j = pl.program_id(1)
    tn, tc = x_ref.shape

    @pl.when(j == 0)
    def _init():
        m_sc[...] = jnp.full_like(m_sc, -jnp.inf)
        l_sc[...] = jnp.zeros_like(l_sc)
        p_sc[...] = jnp.zeros_like(p_sc)

    x = x_ref[...].astype(jnp.float32)              # upcast after load (bf16 input ok)

    # ---- online logsumexp over the class axis -------------------------------
    m_prev = m_sc[...]                              # (tn, 1)
    m_new = jnp.maximum(m_prev, jnp.max(x, axis=-1, keepdims=True))
    l_sc[...] = (l_sc[...] * jnp.exp(m_prev - m_new)
                 + jnp.sum(jnp.exp(x - m_new), axis=-1, keepdims=True))
    m_sc[...] = m_new

    # ---- fused gamma-weighted gather: w = g*[c==t] + (1-g)*[c==pt] -----------
    g = gamma_ref[0, 0]
    cls = j * tc + jax.lax.broadcasted_iota(jnp.int32, (tn, tc), 1)
    w = (jnp.where(cls == t_ref[...], g, 0.0)
         + jnp.where(cls == pt_ref[...], 1.0 - g, 0.0))
    p_sc[...] += jnp.sum(w * x, axis=-1, keepdims=True)

    # ---- finalize: per-row loss term = lse_row - weighted_pick_row -----------
    @pl.when(j == pl.num_programs(1) - 1)
    def _finalize():
        out_ref[...] = m_sc[...] + jnp.log(l_sc[...]) - p_sc[...]


def integer_mix_loss(mix_input, gamma, target, perm_target,
                     *, tile_n=256, tile_c=2048):
    """gamma * CE(mix_input, target) + (1-gamma) * CE(mix_input, perm_target)."""
    # TODO(synk): torch.nn.CrossEntropyLoss's default ignore_index=-100 is not
    # replicated; labels are assumed to be valid class indices in [0, C).
    n, c = mix_input.shape

    # Tile sizes: sublane/lane aligned, shrunk for small problems.
    tn = min(_round_up(tile_n, 8), _round_up(n, 8))
    tc = min(_round_up(tile_c, 128), _round_up(c, 128))
    n_pad = _round_up(n, tn)
    c_pad = _round_up(c, tc)

    # Pad: class padding gets a huge negative value (vanishes from the LSE and
    # is never selected by a valid label); padded rows are sliced off later.
    x = jnp.pad(mix_input, ((0, n_pad - n), (0, c_pad - c)),
                constant_values=((0.0, 0.0), (0.0, _NEG_FILL)))
    t = jnp.pad(target.astype(jnp.int32), (0, n_pad - n)).reshape(n_pad, 1)
    pt = jnp.pad(perm_target.astype(jnp.int32), (0, n_pad - n)).reshape(n_pad, 1)
    gamma_arr = jnp.asarray(gamma, dtype=jnp.float32).reshape(1, 1)

    grid = (n_pad // tn, c_pad // tc)

    row_loss = pl.pallas_call(
        _integer_mix_loss_kernel,
        out_shape=jax.ShapeDtypeStruct((n_pad, 1), jnp.float32),
        grid_spec=pltpu.PrefetchScalarGridSpec(
            num_scalar_prefetch=0,
            grid=grid,
            in_specs=[
                pl.BlockSpec(memory_space=pltpu.MemorySpace.SMEM),     # gamma scalar
                pl.BlockSpec((tn, tc), lambda i, j: (i, j)),           # logits tile
                pl.BlockSpec((tn, 1), lambda i, j: (i, 0)),            # target (resident over C)
                pl.BlockSpec((tn, 1), lambda i, j: (i, 0)),            # perm_target
            ],
            out_specs=pl.BlockSpec((tn, 1), lambda i, j: (i, 0)),      # per-row loss term
            scratch_shapes=[
                pltpu.VMEM((tn, 1), jnp.float32),   # running row max
                pltpu.VMEM((tn, 1), jnp.float32),   # running sum of exp
                pltpu.VMEM((tn, 1), jnp.float32),   # gamma-weighted picked logits
            ],
        ),
        compiler_params=pltpu.CompilerParams(
            dimension_semantics=("parallel", "arbitrary"),
            vmem_limit_bytes=48 * 1024 * 1024,
        ),
    )(gamma_arr, x, t, pt)

    return jnp.sum(row_loss[:n, 0]) / n


def _reference(mix_input, gamma, target, perm_target):
    """Pure-JAX reference matching torch.nn.CrossEntropyLoss (mean reduction)."""
    logp = jax.nn.log_softmax(mix_input.astype(jnp.float32), axis=-1)
    pick_t = jnp.take_along_axis(logp, target[:, None].astype(jnp.int32), axis=-1)
    pick_pt = jnp.take_along_axis(logp, perm_target[:, None].astype(jnp.int32), axis=-1)
    return gamma * (-jnp.mean(pick_t)) + (1.0 - gamma) * (-jnp.mean(pick_pt))


if __name__ == "__main__":
    key = jax.random.PRNGKey(0)
    k1, k2, k3 = jax.random.split(key, 3)

    N, C = 10, 300          # batch=10, classes=300 (non-aligned -> exercises padding)
    gamma = 0.7

    mix_input = jax.random.normal(k1, (N, C), dtype=jnp.float32)
    target = jax.random.randint(k2, (N,), 0, C, dtype=jnp.int32)
    perm_target = jax.random.randint(k3, (N,), 0, C, dtype=jnp.int32)

    # Small tiles so the (N-tiles, C-tiles) grid and online LSE are exercised.
    loss = integer_mix_loss(mix_input, gamma, target, perm_target,
                            tile_n=8, tile_c=128)
    loss = jax.block_until_ready(loss)
    ref = _reference(mix_input, gamma, target, perm_target)
    assert jnp.allclose(loss, ref, atol=1e-5, rtol=1e-5), (loss, ref)

    # bf16 logits path: no wrapper-side upcast, kernel upcasts after load.
    mix_bf16 = mix_input.astype(jnp.bfloat16)
    loss_bf16 = integer_mix_loss(mix_bf16, gamma, target, perm_target,
                                 tile_n=8, tile_c=128)
    loss_bf16 = jax.block_until_ready(loss_bf16)
    ref_bf16 = _reference(mix_bf16.astype(jnp.float32), gamma, target, perm_target)
    assert jnp.allclose(loss_bf16, ref_bf16, atol=1e-4, rtol=1e-4), (loss_bf16, ref_bf16)

    print("KERNEL_OK")
</pallas_src>

<mosaic_0001>
module attributes {stable_mosaic.version = 11 : i64} {
  func.func @_integer_mix_loss_kernel(%arg0: i32, %arg1: i32, %arg2: memref<1x1xf32, #tpu.memory_space<smem>>, %arg3: memref<8x128xf32, #tpu.memory_space<vmem>>, %arg4: memref<8x1xi32, #tpu.memory_space<vmem>>, %arg5: memref<8x1xi32, #tpu.memory_space<vmem>>, %arg6: memref<8x1xf32, #tpu.memory_space<vmem>>, %arg7: memref<8x1xf32, #tpu.memory_space<vmem>>, %arg8: memref<8x1xf32, #tpu.memory_space<vmem>>, %arg9: memref<8x1xf32, #tpu.memory_space<vmem>>) attributes {dimension_semantics = [#tpu.dimension_semantics<parallel>, #tpu.dimension_semantics<arbitrary>], iteration_bounds = array<i64: 2, 3>, scalar_prefetch = 0 : i64, scratch_operands = 3 : i64, tpu.core_type = #tpu.core_type<tc>, window_params = [{transform_indices = @transform_0, window_bounds = array<i64: 1, 1>}, {transform_indices = @transform_1, window_bounds = array<i64: 8, 128>}, {transform_indices = @transform_2, window_bounds = array<i64: 8, 1>}, {transform_indices = @transform_3, window_bounds = array<i64: 8, 1>}, {transform_indices = @transform_4, window_bounds = array<i64: 8, 1>}]} {
    %c0_i32 = arith.constant 0 : i32
    %0 = arith.cmpi eq, %arg1, %c0_i32 : i32
    %1 = arith.extui %0 : i1 to i32
    %c0_i32_0 = arith.constant 0 : i32
    %2 = arith.cmpi ne, %1, %c0_i32_0 : i32
    scf.if %2 {
      %cst_26 = arith.constant 0xFF800000 : f32
      %48 = vector.broadcast %cst_26 : f32 to vector<8x1xf32>
      %c0_27 = arith.constant 0 : index
      %c0_28 = arith.constant 0 : index
      %49 = vector.load %arg7[%c0_27, %c0_28] : memref<8x1xf32, #tpu.memory_space<vmem>>, vector<8x1xf32>
      tpu.vector_store %arg7[%c0_27, %c0_28], %48 {strides = array<i32>} : memref<8x1xf32, #tpu.memory_space<vmem>>, vector<8x1xf32>,
      %cst_29 = arith.constant 0.000000e+00 : f32
      %50 = vector.broadcast %cst_29 : f32 to vector<8x1xf32>
      %c0_30 = arith.constant 0 : index
      %c0_31 = arith.constant 0 : index
      %51 = vector.load %arg8[%c0_30, %c0_31] : memref<8x1xf32, #tpu.memory_space<vmem>>, vector<8x1xf32>
      tpu.vector_store %arg8[%c0_30, %c0_31], %50 {strides = array<i32>} : memref<8x1xf32, #tpu.memory_space<vmem>>, vector<8x1xf32>,
      %cst_32 = arith.constant 0.000000e+00 : f32
      %52 = vector.broadcast %cst_32 : f32 to vector<8x1xf32>
      %c0_33 = arith.constant 0 : index
      %c0_34 = arith.constant 0 : index
      %53 = vector.load %arg9[%c0_33, %c0_34] : memref<8x1xf32, #tpu.memory_space<vmem>>, vector<8x1xf32>
      tpu.vector_store %arg9[%c0_33, %c0_34], %52 {strides = array<i32>} : memref<8x1xf32, #tpu.memory_space<vmem>>, vector<8x1xf32>,
    } else {
    }
    %c0 = arith.constant 0 : index
    %c0_1 = arith.constant 0 : index
    %3 = vector.load %arg3[%c0, %c0_1] : memref<8x128xf32, #tpu.memory_space<vmem>>, vector<8x128xf32>
    %c0_2 = arith.constant 0 : index
    %c0_3 = arith.constant 0 : index
    %4 = vector.load %arg7[%c0_2, %c0_3] : memref<8x1xf32, #tpu.memory_space<vmem>>, vector<8x1xf32>
    %cst = arith.constant dense<0xFF800000> : vector<8xf32>
    %5 = vector.multi_reduction <maximumf>, %3, %cst [1] : vector<8x128xf32> to vector<8xf32>
    %6 = vector.shape_cast %5 : vector<8xf32> to vector<8x1xf32>
    %7 = arith.maximumf %4, %6 : vector<8x1xf32>
    %c0_4 = arith.constant 0 : index
    %c0_5 = arith.constant 0 : index
    %8 = vector.load %arg8[%c0_4, %c0_5] : memref<8x1xf32, #tpu.memory_space<vmem>>, vector<8x1xf32>
    %9 = arith.subf %4, %7 : vector<8x1xf32>
    %10 = math.exp %9 : vector<8x1xf32>
    %11 = arith.mulf %8, %10 : vector<8x1xf32>
    %12 = vector.broadcast %7 : vector<8x1xf32> to vector<8x128xf32>
    %13 = arith.subf %3, %12 : vector<8x128xf32>
    %14 = math.exp %13 : vector<8x128xf32>
    %cst_6 = arith.constant dense<0.000000e+00> : vector<8xf32>
    %15 = vector.multi_reduction <add>, %14, %cst_6 [1] : vector<8x128xf32> to vector<8xf32>
    %16 = vector.shape_cast %15 : vector<8xf32> to vector<8x1xf32>
    %17 = arith.addf %11, %16 : vector<8x1xf32>
    %c0_7 = arith.constant 0 : index
    %c0_8 = arith.constant 0 : index
    %18 = vector.load %arg8[%c0_7, %c0_8] : memref<8x1xf32, #tpu.memory_space<vmem>>, vector<8x1xf32>
    tpu.vector_store %arg8[%c0_7, %c0_8], %17 {strides = array<i32>} : memref<8x1xf32, #tpu.memory_space<vmem>>, vector<8x1xf32>,
    %c0_9 = arith.constant 0 : index
    %c0_10 = arith.constant 0 : index
    %19 = vector.load %arg7[%c0_9, %c0_10] : memref<8x1xf32, #tpu.memory_space<vmem>>, vector<8x1xf32>
    tpu.vector_store %arg7[%c0_9, %c0_10], %7 {strides = array<i32>} : memref<8x1xf32, #tpu.memory_space<vmem>>, vector<8x1xf32>,
    %c0_11 = arith.constant 0 : index
    %c0_12 = arith.constant 0 : index
    %20 = memref.load %arg2[%c0_11, %c0_12] : memref<1x1xf32, #tpu.memory_space<smem>>
    %c128_i32 = arith.constant 128 : i32
    %21 = arith.muli %arg1, %c128_i32 : i32
    %22 = tpu.iota {dimensions = array<i32: 1>} : vector<8x128xi32>
    %23 = vector.broadcast %21 : i32 to vector<8x128xi32>
    %24 = arith.addi %23, %22 : vector<8x128xi32>
    %c0_13 = arith.constant 0 : index
    %c0_14 = arith.constant 0 : index
    %25 = vector.load %arg4[%c0_13, %c0_14] : memref<8x1xi32, #tpu.memory_space<vmem>>, vector<8x1xi32>
    %26 = vector.broadcast %25 : vector<8x1xi32> to vector<8x128xi32>
    %27 = arith.cmpi eq, %24, %26 : vector<8x128xi32>
    %cst_15 = arith.constant 0.000000e+00 : f32
    %28 = vector.broadcast %20 : f32 to vector<8x128xf32>
    %29 = vector.broadcast %cst_15 : f32 to vector<8x128xf32>
    %30 = arith.select %27, %28, %29 : vector<8x128xi1>, vector<8x128xf32>
    %c0_16 = arith.constant 0 : index
    %c0_17 = arith.constant 0 : index
    %31 = vector.load %arg5[%c0_16, %c0_17] : memref<8x1xi32, #tpu.memory_space<vmem>>, vector<8x1xi32>
    %32 = vector.broadcast %31 : vector<8x1xi32> to vector<8x128xi32>
    %33 = arith.cmpi eq, %24, %32 : vector<8x128xi32>
    %cst_18 = arith.constant 1.000000e+00 : f32
    %34 = arith.subf %cst_18, %20 : f32
    %cst_19 = arith.constant 0.000000e+00 : f32
    %35 = vector.broadcast %34 : f32 to vector<8x128xf32>
    %36 = vector.broadcast %cst_19 : f32 to vector<8x128xf32>
    %37 = arith.select %33, %35, %36 : vector<8x128xi1>, vector<8x128xf32>
    %38 = arith.addf %30, %37 : vector<8x128xf32>
    %c0_20 = arith.constant 0 : index
    %c0_21 = arith.constant 0 : index
    %39 = vector.load %arg9[%c0_20, %c0_21] : memref<8x1xf32, #tpu.memory_space<vmem>>, vector<8x1xf32>
    %40 = arith.mulf %38, %3 : vector<8x128xf32>
    %cst_22 = arith.constant dense<0.000000e+00> : vector<8xf32>
    %41 = vector.multi_reduction <add>, %40, %cst_22 [1] : vector<8x128xf32> to vector<8xf32>
    %42 = vector.shape_cast %41 : vector<8xf32> to vector<8x1xf32>
    %43 = arith.addf %39, %42 : vector<8x1xf32>
    %c0_23 = arith.constant 0 : index
    %c0_24 = arith.constant 0 : index
    %44 = vector.load %arg9[%c0_23, %c0_24] : memref<8x1xf32, #tpu.memory_space<vmem>>, vector<8x1xf32>
    tpu.vector_store %arg9[%c0_23, %c0_24], %43 {strides = array<i32>} : memref<8x1xf32, #tpu.memory_space<vmem>>, vector<8x1xf32>,
    %c2_i32 = arith.constant 2 : i32
    %45 = arith.cmpi eq, %arg1, %c2_i32 : i32
    %46 = arith.extui %45 : i1 to i32
    %c0_i32_25 = arith.constant 0 : i32
    %47 = arith.cmpi ne, %46, %c0_i32_25 : i32
    scf.if %47 {
      %c0_26 = arith.constant 0 : index
      %c0_27 = arith.constant 0 : index
      %48 = vector.load %arg7[%c0_26, %c0_27] : memref<8x1xf32, #tpu.memory_space<vmem>>, vector<8x1xf32>
      %c0_28 = arith.constant 0 : index
      %c0_29 = arith.constant 0 : index
      %49 = vector.load %arg8[%c0_28, %c0_29] : memref<8x1xf32, #tpu.memory_space<vmem>>, vector<8x1xf32>
      %50 = math.log %49 : vector<8x1xf32>
      %51 = arith.addf %48, %50 : vector<8x1xf32>
      %c0_30 = arith.constant 0 : index
      %c0_31 = arith.constant 0 : index
      %52 = vector.load %arg9[%c0_30, %c0_31] : memref<8x1xf32, #tpu.memory_space<vmem>>, vector<8x1xf32>
      %53 = arith.subf %51, %52 : vector<8x1xf32>
      %c0_32 = arith.constant 0 : index
      %c0_33 = arith.constant 0 : index
      %54 = vector.load %arg6[%c0_32, %c0_33] : memref<8x1xf32, #tpu.memory_space<vmem>>, vector<8x1xf32>
      tpu.vector_store %arg6[%c0_32, %c0_33], %53 {strides = array<i32>} : memref<8x1xf32, #tpu.memory_space<vmem>>, vector<8x1xf32>,
    } else {
    }
    return
  }
  func.func @transform_0(%arg0: i32, %arg1: i32) -> (i32, i32) {
    %c0_i32 = arith.constant 0 : i32
    %c0_i32_0 = arith.constant 0 : i32
    %c0_i32_1 = arith.constant 0 : i32
    return %c0_i32, %c0_i32_0 : i32, i32
  }
  func.func @transform_1(%arg0: i32, %arg1: i32) -> (i32, i32) {
    %c0_i32 = arith.constant 0 : i32
    return %arg0, %arg1 : i32, i32
  }
  func.func @transform_2(%arg0: i32, %arg1: i32) -> (i32, i32) {
    %c0_i32 = arith.constant 0 : i32
    %c0_i32_0 = arith.constant 0 : i32
    return %arg0, %c0_i32 : i32, i32
  }
  func.func @transform_3(%arg0: i32, %arg1: i32) -> (i32, i32) {
    %c0_i32 = arith.constant 0 : i32
    %c0_i32_0 = arith.constant 0 : i32
    return %arg0, %c0_i32 : i32, i32
  }
  func.func @transform_4(%arg0: i32, %arg1: i32) -> (i32, i32) {
    %c0_i32 = arith.constant 0 : i32
    %c0_i32_0 = arith.constant 0 : i32
    return %arg0, %c0_i32 : i32, i32
  }
}

</mosaic_0001>

<bundles_post_ra>
// kernel: tpu_custom_call.1
= control target key start
LH: loop header
LB: loop body
LE: loop exit
PB: predicated region body
PF: predicated region fallthrough
CT: control target
= control target key end

     0   :  { %s804_s0 = inlined_call_operand.<no memory space> [shape: f32[1,1], index: 0, kind: input, shape index: {}]   ;;  %s805_s1 = inlined_call_operand.hbm [shape: f32[16,384], index: 1, kind: input, shape index: {}]   ;;  %s806_s2 = inlined_call_operand.vmem [shape: s32[16,1], index: 2, kind: input, shape index: {}]   ;;  %s807_s3 = inlined_call_operand.vmem [shape: s32[16,1], index: 3, kind: input, shape index: {}]   ;;  %s808_s4 = inlined_call_operand.vmem [shape: f32[16,1], index: 4, kind: output, shape index: {}]  }
   0x1   :  { %9 = sst [smem:[#allocation5]] %s804_s0 }
   0x2   :  { %10 = vsyncpa [#allocation7], 0 }
   0x3   :  { %12 = vsyncpa [#allocation7 + $0x1], 0  ;;  %s668_s17 = smov 0   ;;  %s670_s18 = smov 0  }
   0x4   :  { %s672_s19 = smov 0   ;;  %s674_s20 = smov 0  }
   0x5   :  { %s676_s21 = smov 0   ;;  %s678_s22 = smov 0  }
   0x6   :  { %s680_s23 = smov 0   ;;  %s682_s24 = smov 0  }
   0x7 LB: > { %s440_s0 = sadd.s32 4294967295, %s635_s24   ;;  %s27_s25 = sadd.s32 1, %s627_s22  ;;  %s635_s24 = sphi %s682_s24, %s18_s24   ;;  %s631_s23 = sphi %s680_s23, %s817_s23   ;;  %s627_s22 = sphi %s678_s22, %s816_s22   ;;  %s623_s21 = sphi %s676_s21, %s815_s21   ;;  %s619_s20 = sphi %s674_s20, %s814_s20   ;;  %s615_s19 = sphi %s672_s19, %s813_s19   ;;  %s611_s18 = sphi %s670_s18, %s812_s18   ;;  %s607_s17 = sphi %s668_s17, %s811_s17  }
   0x8   : > { %p28_p0 = scmp.ge.s32.totalorder %s27_s25, 3  ;;  %s30_s26 = sadd.s32 1, %s631_s23 }
   0x9   : > { %s60_s27 = sadd.s32 1, %s615_s19  ;;  %p67_p1 = scmp.ne.s32.totalorder %s615_s19, %s611_s18 }
   0xa   : > { %s819_s25 = smov (%p28_p0, %s27_s25), 0  ;;  %s821_s26 = smov (!%p28_p0, %s30_s26), %s631_s23 }
   0xb   : > { %s56_s28 = ssub.s32 %s627_s22, %s819_s25  ;;  %p68_p2 = scmp.eq.s32.totalorder %s635_s24, 0 }
   0xc   : > { %p32_p3 = scmp.ge.s32.totalorder %s821_s26, 2  ;;  %p73_p4 = scmp.ne.s32.totalorder %s611_s18, %s607_s17 }
   0xd   : > { %p719_p5 = por %p68_p2, %p67_p1  ;;  %p74_p6 = scmp.eq.s32.totalorder %s440_s0, 0 }
   0xe   : > { %s823_s26 = smov (%p32_p3, %s821_s26), 0  ;;  %p463_p8 = scmp.lt.s32.totalorder %s635_s24, 6 }
   0xf   : > { %p725_p7 = por %p74_p6, %p73_p4  ;;  %s55_s5 = ssub.s32 %s631_s23, %s823_s26 }
  0x10   : > { %s57_s6 = sor.u32 %s56_s28, %s55_s5  ;;  %s178_s7 = sand.u32 1, %s615_s19  }
  0x11   : > { %p58_p9 = scmp.eq.s32.totalorder %s57_s6, 0  ;;  %s444_s8 = sshll.u32 %s178_s7, 3 }
  0x12   : > { %s456_s9 = smul.u32 3, %s631_s23  ;;  %s182_s13 = scalar_lea.vmem [#allocation6], %s444_s8 }
  0x13   : > { %s735_s10 = scalar_select %p58_p9, %s615_s19, %s60_s27  }
  0x14   : > { %s186_s11 = sadd.s32 %s627_s22, %s456_s9  ;;  %s192_s14 = sshll.u32 %s182_s13, 4  ;;  %s193_s14 = int_to_ptr.vmem [resolvable:$true] %s192_s14 }
  0x15   : > { %s445_s12 = sshll.u32 %s186_s11, 3  ;;  %p460_p10 = pnand %p463_p8, %p719_p5 }
  0x16   : > { %s188_s17 = scalar_lea.hbm %s805_s1, %s445_s12  ;;  %p446_p11 = scmp.ge.s32.totalorder %s635_s24, 1 }
  0x17   : > { %s190_s0 = sshll.u32 %s188_s17, 4  ;;  %p211_p12 = scmp.lt.s32.totalorder %s635_s24, 7  ;;  %s191_s0 = int_to_ptr.hbm [resolvable:$true] %s190_s0 }
  0x18   : > { %s179_s28 = scalar_lea.sflag [#allocation7], %s178_s7 }
  0x19   : > { %462 = dma.hbm_to_vmem [thread:$0]  (!%p460_p10), %s191_s0, 128, %s193_s14, %s179_s28  }
  0x1a   : > { %p212_p13 = pnand %p446_p11, %p211_p12 }
  0x1b   : > { %s217_s27 = sand.u32 (!%p212_p13), 1, %s611_s18  }
  0x1c   : > { %215 = sbr.rel (%p212_p13) target bundleno = 432 (0x1b0), region = 36  ;;  %s447_s5 = sshll.u32 (!%p212_p13), %s217_s27, 3 }
  0x1d   : > { %s218_s6 = scalar_lea.sflag (!%p212_p13), [#allocation7], %s217_s27  ;;  %s221_s8 = scalar_lea.vmem (!%p212_p13), [#allocation6], %s447_s5 }
  0x21   : > { %602 = dma.done.wait (%p725_p7), %s218_s6, 128  }
  0x22   : > { %604 = vsyncadd (%p725_p7), %s218_s6, 4294967168  ;;  %p254_p0 = scmp.lt.s32.totalorder %s623_s21, 1  ;;  %p451_p1 = scmp.ne.s32.totalorder %s619_s20, 0 }
  0x24   : > { %s825_s21 = smov (!%p254_p0, %s623_s21), 1  ;;  %269 = sbr.rel (%p451_p1) target bundleno = 45 (0x2d), region = 44 }
  0x25   : > { %s754_s29 = sshll.u32 %s825_s21, 3 }
  0x26   : > { %s257_s11 = scalar_lea.vmem %s806_s2, %s754_s29  ;;  %s261_s14 = scalar_lea.vmem %s807_s3, %s754_s29 }
  0x27   : > { %s265_s16 = scalar_lea.vmem %s808_s4, %s754_s29 }
  0x29   : > { %vm270_vm0 = vcmask 7168   ;;  %v637_v0 = vmov -inf   ;;  %v638_v1 = vmov 0.0  }
  0x2a   : > { %271 = vst.msk [vmem:[#allocation2] sm:$0xff] %vm270_vm0, %v637_v0 }
  0x2b   : > { %272 = vst.msk [vmem:[#allocation3] sm:$0xff] %vm270_vm0, %v638_v1 }
  0x2c   : > { %273 = vst.msk [vmem:[#allocation4] sm:$0xff] %vm270_vm0, %v638_v1 }
  0x2d PF: > { %v274_v2 = vld [vmem:[%s221_s8] sm:$0xff]  ;;  %v639_v4 = vmov 0   ;;  %vm295_vm1 = vcmask 7168   ;;  %s298_s21 = sld [smem:[#allocation5]]  ;;  %v300_v11 = vlaneseq  ;;  %s452_s17 = sshll.u32 %s619_s20, 7 }
  0x2e   : > { %v304_v3 = vld [vmem:[%s257_s11] sm:$0xff]  ;;  %276 = vmax.xlane.f32.xlu0 %v274_v2  ;;  %532 = vset.pattern.permute.xlu1 %v639_v4  ;;  %v302_v14 = vstv %s452_s17  ;;  %p453_p2 = scmp.ne.s32.totalorder %s619_s20, 2 }
  0x2f   : > { %306 = vperm.xlu1 %532, %v304_v3   ;;  %531 = vset.pattern.permute.xlu0 %v639_v4  ;;  %v311_v5 = vld [vmem:[%s261_s14] sm:$0xff]  ;;  %v301_v12 = vand.u32 127, %v300_v11 }
  0x31   : > { %v275_v6 = vld [vmem:[#allocation2] sm:$0xff]  ;;  %v303_v17 = vadd.s32 %v302_v14, %v301_v12 }
  0x32   : > { %v279_v28 = vld [vmem:[#allocation3] sm:$0xff] }
  0x33   : > { %s316_s0 = ssub.f32 1.0, %s298_s21  ;;  %v309_v19 = vstv %s298_s21  ;;  %v320_v32 = vld [vmem:[#allocation4] sm:$0xff] }
  0x35   : > { %v317_v20 = vstv %s316_s0 }
  0x37   : > { %313 = vperm.xlu1 %532, %v311_v5  }
  0xa1   : > { %v277_v7 = vpop.xlane.xlu0 %276  ;;  %v307_v10 = vpop.permute.xlu1 %306 }
  0xa2   : > { %v278_v8 = vmax.f32 %v275_v6, %v277_v7  ;;  %vm308_vm2 = vcmp.eq.s32.totalorder %v303_v17, %v307_v10 }
  0xa3   : > { %v310_v22 = vsel %vm308_vm2, %v309_v19, 0.0 }
  0xa4   : > { %v280_v9 = vsub.f32 %v275_v6, %v278_v8  ;;  %297 = vst.msk [vmem:[#allocation2] sm:$0xff] %vm295_vm1, %v278_v8  ;;  %286 = vperm.xlu0 %531, %v278_v8  }
  0xa6   : > { %v281_v26 = vmul.f32 1.442695, %v280_v9 }
  0xa9   : > { %v314_v18 = vpop.permute.xlu1 %313 }
  0xaa   : > { %vm315_vm3 = vcmp.eq.s32.totalorder %v303_v17, %v314_v18 }
  0xab   : > { %v318_v23 = vsel %vm315_vm3, %v317_v20, 0.0 }
  0xac   : > { %v319_v24 = vadd.f32 %v318_v23, %v310_v22 }
  0xae   : > { %v321_v25 = vmul.f32 %v319_v24, %v274_v2 }
 0x116   : > { %v287_v13 = vpop.permute.xlu0 %286 }
 0x117   : > { %v289_v15 = vsub.f32 %v274_v2, %v287_v13 }
 0x119   : > { %v290_v16 = vmul.f32 1.442695, %v289_v15 }
 0x11b   : > { %533 = vpow2.f32 %v290_v16 }
 0x11c   : > { %535 = vpow2.f32 %v281_v26 }
 0x121   : > { %v534_v21 = vpop.eup %533 }
 0x122   : > { %292 = vadd.xlane.f32.xlu2 %v534_v21  ;;  %v536_v27 = vpop.eup %535 }
 0x123   : > { %v283_v29 = vmul.f32 %v536_v27, %v279_v28 }
 0x12a   : > { %322 = vadd.xlane.f32.xlu2 %v321_v25 }
 0x195   : > { %v293_v30 = vpop.xlane.xlu2 %292 }
 0x196   : > { %v294_v31 = vadd.f32 %v293_v30, %v283_v29 }
 0x198   : > { %296 = vst.msk [vmem:[#allocation3] sm:$0xff] %vm295_vm1, %v294_v31 }
 0x19c   : > { %329 = sbr.rel (%p453_p2) target bundleno = 432 (0x1b0), region = 48 }
 0x19d   : > { %v323_v33 = vpop.xlane.xlu2 %322 }
 0x19e   : > { %v324_v34 = vadd.f32 %v323_v33, %v320_v32 }
 0x1a0   : > { %325 = vst.msk [vmem:[#allocation4] sm:$0xff] %vm295_vm1, %v324_v34 }
 0x1a1   : > { %v331_v35 = vld [vmem:[#allocation3] sm:$0xff]  ;;  %v330_v37 = vld [vmem:[#allocation2] sm:$0xff] }
 0x1a2   : > { %537 = vlog2.f32 %v331_v35 }
 0x1a7   : > { %v335_v39 = vld [vmem:[#allocation4] sm:$0xff] }
 0x1a8   : > { %v538_v36 = vpop.eup %537 }
 0x1a9   : > { %v333_v38 = vmul.f32 0.6931472, %v538_v36 }
 0x1ab   : > { %v334_v40 = vadd.f32 %v333_v38, %v330_v37 }
 0x1ad   : > { %v336_v41 = vsub.f32 %v334_v40, %v335_v39 }
 0x1af   : > { %337 = vst.msk [vmem:[%s265_s16] sm:$0xff] %vm295_vm1, %v336_v41 }
 0x1b0 PF: > { %s18_s24 = sadd.s32 1, %s635_s24   ;;  %s811_s17 = smov %s611_s18 }
 0x1b1   : > { %p15_p3 = scmp.ge.s32.totalorder %s18_s24, 8   ;;  %s812_s18 = smov %s615_s19 }
 0x1b2   : > { %s813_s19 = smov %s735_s10  ;;  %s814_s20 = smov %s627_s22 }
 0x1b3   : > { %s815_s21 = smov %s631_s23  ;;  %s816_s22 = smov %s819_s25 }
 0x1b4   : > { %s817_s23 = smov %s823_s26  ;;  %17 = sbr.rel (!%p15_p3) target bundleno = 7 (0x7), region = 90 }
 0x1b9   :  { %357 = vsyncpa [#allocation7], 1 }
 0x1ba   :  { %359 = vsyncpa [#allocation7 + $0x1], 1 }

</bundles_post_ra>
